<compile_context>
chip_gen: v7x
topology: tpu7x:2x2x1
jax: 0.10.0
libtpu: 0.0.40
codegen_flags: <defaults>
</compile_context>

<pallas_src>
import jax
import jax.numpy as jnp
from jax.experimental import pallas as pl
from jax.experimental.pallas import tpu as pltpu


def _round_up(x, m):
    return ((x + m - 1) // m) * m


def clip_temperature_kernel(inv_t_ref, pix_ref, w_ref, b_ref, txt_ref,
                            out_ref, acc_ref):
    """Grid = (B_pad // tm, F_pad // tk).

    inv_t_ref : SMEM (1,)            f32   1 / temperature
    pix_ref   : VMEM (tm, tk)        bf16  flattened-pixel tile
    w_ref     : VMEM (tk, D_pad)     bf16  projection-weight tile
    b_ref     : VMEM (1, D_pad)      f32   projection bias
    txt_ref   : VMEM (D_pad, T_pad)  bf16  text embeddings, pre-transposed
    out_ref   : VMEM (tm, T_pad)     f32   logits tile (written in finalize only)
    acc_ref   : VMEM (tm, D_pad)     f32   image-embedding accumulator scratch
    """
    k = pl.program_id(1)

    @pl.when(k == 0)
    def _():
        # Seed the accumulator with the projection bias instead of zeros:
        # saves a [tm, D_pad] add in the finalize step.
        acc_ref[...] = jnp.broadcast_to(b_ref[...], acc_ref.shape)

    # "get_image_features" stand-in: bf16 x bf16 projection matmul on the MXU,
    # accumulated in f32 across K tiles.
    acc_ref[...] += jnp.dot(pix_ref[...], w_ref[...],
                            preferred_element_type=jnp.float32)

    @pl.when(k == pl.num_programs(1) - 1)
    def _():
        emb = acc_ref[...]                                    # f32 [tm, D_pad]
        sq_norm = jnp.sum(emb * emb, axis=-1, keepdims=True)  # f32 [tm, 1]
        # L2 normalization fused with the 1/temperature scale (eps guards the
        # zero-padded batch rows; real rows are unaffected).
        scale = jax.lax.rsqrt(sq_norm + 1e-12) * inv_t_ref[0]
        emb_n = emb * scale
        # Similarity matmul; text upcast to f32 (small tile) for tight accuracy.
        out_ref[...] = jnp.dot(emb_n, txt_ref[...].astype(jnp.float32),
                               preferred_element_type=jnp.float32)


def clip_with_learnable_temperature(pixel_values, text_embeddings,
                                    w_proj, b_proj, temperature, *, tk=512):
    """pixel_values: [B, C, H, W] (NCHW). Returns logits [B, T] in f32."""
    B = pixel_values.shape[0]
    flat = pixel_values.reshape(B, -1).astype(jnp.float32)    # [B, F]
    F = flat.shape[1]
    T, D = text_embeddings.shape
    assert w_proj.shape == (F, D)

    # ---- pad everything to (8, 128)/MXU-friendly shapes --------------------
    tm = 128 if B >= 128 else _round_up(B, 8)
    B_pad = _round_up(B, tm)
    tk = max(128, min(tk, _round_up(F, 128)))                 # mult. of 128
    F_pad = _round_up(F, tk)
    D_pad = _round_up(D, 128)
    T_pad = _round_up(T, 128)

    pix = jnp.zeros((B_pad, F_pad), jnp.bfloat16)
    pix = pix.at[:B, :F].set(flat.astype(jnp.bfloat16))
    w = jnp.zeros((F_pad, D_pad), jnp.bfloat16)
    w = w.at[:F, :D].set(w_proj.astype(jnp.bfloat16))
    b = jnp.zeros((1, D_pad), jnp.float32)
    b = b.at[:, :D].set(b_proj.reshape(1, D).astype(jnp.float32))
    txt_t = jnp.zeros((D_pad, T_pad), jnp.bfloat16)
    txt_t = txt_t.at[:D, :T].set(text_embeddings.T.astype(jnp.bfloat16))
    inv_t = (1.0 / jnp.asarray(temperature, jnp.float32)).reshape(1)

    grid = (B_pad // tm, F_pad // tk)

    # Advisory cost hint: dominant projection matmul + small similarity matmul.
    cost = pl.CostEstimate(
        flops=2 * B_pad * F_pad * D_pad + 2 * B_pad * D_pad * T_pad,
        transcendentals=B_pad,   # one rsqrt per row
        bytes_accessed=(pix.size + w.size + txt_t.size) * 2
                       + b.size * 4 + B_pad * T_pad * 4,
    )

    out_padded = pl.pallas_call(
        clip_temperature_kernel,
        out_shape=jax.ShapeDtypeStruct((B_pad, T_pad), jnp.float32),
        grid_spec=pltpu.PrefetchScalarGridSpec(
            num_scalar_prefetch=0,
            grid=grid,
            in_specs=[
                pl.BlockSpec(memory_space=pltpu.MemorySpace.SMEM),   # 1/temperature
                pl.BlockSpec((tm, tk), lambda i, k: (i, k)),         # pixels
                pl.BlockSpec((tk, D_pad), lambda i, k: (k, 0)),      # w_proj
                pl.BlockSpec((1, D_pad), lambda i, k: (0, 0)),       # bias
                pl.BlockSpec((D_pad, T_pad), lambda i, k: (0, 0)),   # text^T
            ],
            out_specs=pl.BlockSpec((tm, T_pad), lambda i, k: (i, 0)),
            scratch_shapes=[pltpu.VMEM((tm, D_pad), jnp.float32)],
        ),
        compiler_params=pltpu.CompilerParams(
            dimension_semantics=("parallel", "arbitrary"),
            vmem_limit_bytes=32 * 1024 * 1024,   # safe on v5e/v6e/v7x
        ),
        cost_estimate=cost,
    )(inv_t, pix, w, b, txt_t)

    return out_padded[:B, :T]


def reference_forward(pixel_values, text_embeddings, w_proj, b_proj, temperature):
    """Pure-JAX reference.  Mirrors the kernel's bf16 MXU-operand contract
    (inputs cast to bf16, all math in f32) so only implementation error —
    accumulation order, rsqrt-vs-divide ulps — remains to be checked."""
    B = pixel_values.shape[0]
    flat = pixel_values.reshape(B, -1).astype(jnp.bfloat16).astype(jnp.float32)
    w = w_proj.astype(jnp.bfloat16).astype(jnp.float32)
    txt = text_embeddings.astype(jnp.bfloat16).astype(jnp.float32)
    emb = flat @ w + b_proj.reshape(1, -1).astype(jnp.float32)
    emb = emb / jnp.linalg.norm(emb, axis=-1, keepdims=True)
    return emb @ txt.T / temperature


if __name__ == "__main__":
    # Small shapes consistent with the forward:
    #   pixel_values: [B=2, C=3, H=16, W=16] -> F = 768 (tk=512 -> 2 K-steps)
    #   image/text embedding dim D = 32, number of text embeddings T = 8
    B, C, H, W = 2, 3, 16, 16
    D, T = 32, 8
    F = C * H * W

    key = jax.random.PRNGKey(0)
    k_pix, k_txt, k_w, k_b = jax.random.split(key, 4)

    pixel_values = jax.random.normal(k_pix, (B, C, H, W), dtype=jnp.float32)
    text_embeddings = jax.random.normal(k_txt, (T, D), dtype=jnp.float32)

    # Deterministic parameter init (synthetic "clip_model" image projection).
    w_proj = jax.random.normal(k_w, (F, D), dtype=jnp.float32) * 0.02
    b_proj = jax.random.normal(k_b, (1, D), dtype=jnp.float32) * 0.02

    # nn.Parameter(torch.tensor(0.3))
    temperature = jnp.float32(0.3)

    logits = clip_with_learnable_temperature(
        pixel_values, text_embeddings, w_proj, b_proj, temperature)
    jax.block_until_ready(logits)

    ref = reference_forward(pixel_values, text_embeddings, w_proj, b_proj,
                            temperature)
    assert logits.shape == (B, T), logits.shape
    assert jnp.allclose(logits, ref, atol=5e-3, rtol=5e-3), (logits, ref)

    print("KERNEL_OK")
</pallas_src>

<mosaic_0001>
module attributes {stable_mosaic.version = 11 : i64} {
  func.func @clip_temperature_kernel(%arg0: i32, %arg1: i32, %arg2: memref<1xf32, #tpu.memory_space<smem>>, %arg3: memref<8x512xbf16, #tpu.memory_space<vmem>>, %arg4: memref<512x128xbf16, #tpu.memory_space<vmem>>, %arg5: memref<1x128xf32, #tpu.memory_space<vmem>>, %arg6: memref<128x128xbf16, #tpu.memory_space<vmem>>, %arg7: memref<8x128xf32, #tpu.memory_space<vmem>>, %arg8: memref<8x128xf32, #tpu.memory_space<vmem>>) attributes {dimension_semantics = [#tpu.dimension_semantics<parallel>, #tpu.dimension_semantics<arbitrary>], iteration_bounds = array<i64: 1, 2>, scalar_prefetch = 0 : i64, scratch_operands = 1 : i64, tpu.core_type = #tpu.core_type<tc>, window_params = [{transform_indices = @transform_0, window_bounds = array<i64: 1>}, {transform_indices = @transform_1, window_bounds = array<i64: 8, 512>}, {transform_indices = @transform_2, window_bounds = array<i64: 512, 128>}, {pipeline_mode = #tpu.pipeline_mode<synchronous>, transform_indices = @transform_3, window_bounds = array<i64: 1, 128>}, {pipeline_mode = #tpu.pipeline_mode<synchronous>, transform_indices = @transform_4, window_bounds = array<i64: 128, 128>}, {transform_indices = @transform_5, window_bounds = array<i64: 8, 128>}]} {
    %c0_i32 = arith.constant 0 : i32
    %0 = arith.cmpi eq, %arg1, %c0_i32 : i32
    %1 = arith.extui %0 : i1 to i32
    %c0_i32_0 = arith.constant 0 : i32
    %2 = arith.cmpi ne, %1, %c0_i32_0 : i32
    scf.if %2 {
      %c0_9 = arith.constant 0 : index
      %c0_10 = arith.constant 0 : index
      %12 = vector.load %arg5[%c0_9, %c0_10] : memref<1x128xf32, #tpu.memory_space<vmem>>, vector<1x128xf32>
      %13 = vector.shape_cast %12 : vector<1x128xf32> to vector<1x128xf32>
      %14 = vector.broadcast %13 : vector<1x128xf32> to vector<8x128xf32>
      %c0_11 = arith.constant 0 : index
      %c0_12 = arith.constant 0 : index
      %15 = vector.load %arg8[%c0_11, %c0_12] : memref<8x128xf32, #tpu.memory_space<vmem>>, vector<8x128xf32>
      tpu.vector_store %arg8[%c0_11, %c0_12], %14 {strides = array<i32>} : memref<8x128xf32, #tpu.memory_space<vmem>>, vector<8x128xf32>,
    } else {
    }
    %c0 = arith.constant 0 : index
    %c0_1 = arith.constant 0 : index
    %3 = vector.load %arg8[%c0, %c0_1] : memref<8x128xf32, #tpu.memory_space<vmem>>, vector<8x128xf32>
    %c0_2 = arith.constant 0 : index
    %c0_3 = arith.constant 0 : index
    %4 = vector.load %arg3[%c0_2, %c0_3] : memref<8x512xbf16, #tpu.memory_space<vmem>>, vector<8x512xbf16>
    %c0_4 = arith.constant 0 : index
    %c0_5 = arith.constant 0 : index
    %5 = vector.load %arg4[%c0_4, %c0_5] : memref<512x128xbf16, #tpu.memory_space<vmem>>, vector<512x128xbf16>
    %cst = arith.constant dense<0.000000e+00> : vector<8x128xf32>
    %6 = tpu.matmul %4, %5, %cst {dimension_numbers = #tpu.dot_dimension_numbers<[1], [0], [0], [1], [0, 0, 1, 1], [], []>} : vector<8x512xbf16>, vector<512x128xbf16>, vector<8x128xf32> -> vector<8x128xf32>
    %7 = arith.addf %3, %6 : vector<8x128xf32>
    %c0_6 = arith.constant 0 : index
    %c0_7 = arith.constant 0 : index
    %8 = vector.load %arg8[%c0_6, %c0_7] : memref<8x128xf32, #tpu.memory_space<vmem>>, vector<8x128xf32>
    tpu.vector_store %arg8[%c0_6, %c0_7], %7 {strides = array<i32>} : memref<8x128xf32, #tpu.memory_space<vmem>>, vector<8x128xf32>,
    %c1_i32 = arith.constant 1 : i32
    %9 = arith.cmpi eq, %arg1, %c1_i32 : i32
    %10 = arith.extui %9 : i1 to i32
    %c0_i32_8 = arith.constant 0 : i32
    %11 = arith.cmpi ne, %10, %c0_i32_8 : i32
    scf.if %11 {
      %c0_9 = arith.constant 0 : index
      %c0_10 = arith.constant 0 : index
      %12 = vector.load %arg8[%c0_9, %c0_10] : memref<8x128xf32, #tpu.memory_space<vmem>>, vector<8x128xf32>
      %13 = arith.mulf %12, %12 : vector<8x128xf32>
      %cst_11 = arith.constant dense<0.000000e+00> : vector<8xf32>
      %14 = vector.multi_reduction <add>, %13, %cst_11 [1] : vector<8x128xf32> to vector<8xf32>
      %15 = vector.shape_cast %14 : vector<8xf32> to vector<8x1xf32>
      %cst_12 = arith.constant 9.99999996E-13 : f32
      %16 = vector.broadcast %cst_12 : f32 to vector<8x1xf32>
      %17 = arith.addf %15, %16 : vector<8x1xf32>
      %18 = math.rsqrt %17 : vector<8x1xf32>
      %c0_13 = arith.constant 0 : index
      %19 = memref.load %arg2[%c0_13] : memref<1xf32, #tpu.memory_space<smem>>
      %20 = vector.broadcast %19 : f32 to vector<8x1xf32>
      %21 = arith.mulf %18, %20 : vector<8x1xf32>
      %22 = vector.broadcast %21 : vector<8x1xf32> to vector<8x128xf32>
      %23 = arith.mulf %12, %22 : vector<8x128xf32>
      %c0_14 = arith.constant 0 : index
      %c0_15 = arith.constant 0 : index
      %24 = vector.load %arg6[%c0_14, %c0_15] : memref<128x128xbf16, #tpu.memory_space<vmem>>, vector<128x128xbf16>
      %25 = arith.extf %24 : vector<128x128xbf16> to vector<128x128xf32>
      %cst_16 = arith.constant dense<0.000000e+00> : vector<8x128xf32>
      %26 = tpu.matmul %23, %25, %cst_16 {dimension_numbers = #tpu.dot_dimension_numbers<[1], [0], [0], [1], [0, 0, 1, 1], [], []>} : vector<8x128xf32>, vector<128x128xf32>, vector<8x128xf32> -> vector<8x128xf32>
      %c0_17 = arith.constant 0 : index
      %c0_18 = arith.constant 0 : index
      %27 = vector.load %arg7[%c0_17, %c0_18] : memref<8x128xf32, #tpu.memory_space<vmem>>, vector<8x128xf32>
      tpu.vector_store %arg7[%c0_17, %c0_18], %26 {strides = array<i32>} : memref<8x128xf32, #tpu.memory_space<vmem>>, vector<8x128xf32>,
    } else {
    }
    return
  }
  func.func @transform_0(%arg0: i32, %arg1: i32) -> i32 {
    %c0_i32 = arith.constant 0 : i32
    %c0_i32_0 = arith.constant 0 : i32
    return %c0_i32 : i32
  }
  func.func @transform_1(%arg0: i32, %arg1: i32) -> (i32, i32) {
    %c0_i32 = arith.constant 0 : i32
    return %arg0, %arg1 : i32, i32
  }
  func.func @transform_2(%arg0: i32, %arg1: i32) -> (i32, i32) {
    %c0_i32 = arith.constant 0 : i32
    %c0_i32_0 = arith.constant 0 : i32
    return %arg1, %c0_i32 : i32, i32
  }
  func.func @transform_3(%arg0: i32, %arg1: i32) -> (i32, i32) {
    %c0_i32 = arith.constant 0 : i32
    %c0_i32_0 = arith.constant 0 : i32
    %c0_i32_1 = arith.constant 0 : i32
    return %c0_i32, %c0_i32_0 : i32, i32
  }
  func.func @transform_4(%arg0: i32, %arg1: i32) -> (i32, i32) {
    %c0_i32 = arith.constant 0 : i32
    %c0_i32_0 = arith.constant 0 : i32
    %c0_i32_1 = arith.constant 0 : i32
    return %c0_i32, %c0_i32_0 : i32, i32
  }
  func.func @transform_5(%arg0: i32, %arg1: i32) -> (i32, i32) {
    %c0_i32 = arith.constant 0 : i32
    %c0_i32_0 = arith.constant 0 : i32
    return %arg0, %c0_i32 : i32, i32
  }
}

</mosaic_0001>

<bundles_post_ra>
// kernel: tpu_custom_call.1
= control target key start
LH: loop header
LB: loop body
LE: loop exit
PB: predicated region body
PF: predicated region fallthrough
CT: control target
= control target key end

     0   :  { %s1724_s0 = inlined_call_operand.<no memory space> [shape: f32[1], index: 0, kind: input, shape index: {}]   ;;  %s1725_s1 = inlined_call_operand.hbm [shape: bf16[8,1024], index: 1, kind: input, shape index: {}]   ;;  %s1726_s2 = inlined_call_operand.hbm [shape: bf16[1024,128], index: 2, kind: input, shape index: {}]   ;;  %s1727_s3 = inlined_call_operand.vmem [shape: f32[1,128], index: 3, kind: input, shape index: {}]   ;;  %s1728_s4 = inlined_call_operand.hbm [shape: bf16[128,128], index: 4, kind: input, shape index: {}]   ;;  %s1729_s5 = inlined_call_operand.hbm [shape: f32[8,128], index: 5, kind: output, shape index: {}]  }
   0x1   :  { %10 = sst [smem:[#allocation3]] %s1724_s0 }
   0x2   :  { %11 = vsyncpa [#allocation5], 0 }
   0x3   :  { %13 = vsyncpa [#allocation5 + $0x1], 0 }
   0x4   :  { %14 = vsyncpa [#allocation8], 0 }
   0x5   :  { %16 = vsyncpa [#allocation8 + $0x1], 0 }
   0x6   :  { %17 = vsyncpa [#allocation6], 0  ;;  %s1456_s20 = smov 0   ;;  %s1458_s21 = smov 0  }
   0x7   :  { %s1460_s22 = smov 0   ;;  %s1462_s23 = smov 0  }
   0x8   :  { %s1464_s24 = smov 0   ;;  %s1466_s25 = smov 0  }
   0x9 LB: > { %s1485_s0 = sadd.s32 4294967295, %s1412_s25   ;;  %p78_p0 = scmp.ne.s32.totalorder %s1396_s21, %s1392_s20  ;;  %s1412_s25 = sphi %s1466_s25, %s23_s25   ;;  %s1408_s24 = sphi %s1464_s24, %s1747_s24   ;;  %s1404_s23 = sphi %s1462_s23, %s1746_s23   ;;  %s1400_s22 = sphi %s1460_s22, %s1745_s22   ;;  %s1396_s21 = sphi %s1458_s21, %s1744_s21   ;;  %s1392_s20 = sphi %s1456_s20, %s1743_s20  }
   0xa   : > { %p1730_p1 = scmp.eq.s32.totalorder %s1485_s0, 0  ;;  %p898_p2 = scmp.ge.s32.totalorder %s1412_s25, 1 }
   0xb   : > { %p183_p3 = scmp.lt.s32.totalorder %s1412_s25, 3  ;;  %s1414_s28 = smov [#allocation9]  }
   0xc   : > { %p1493_p4 = por %p1730_p1, %p78_p0  ;;  %s201_s29 = sshll.u32 %s1414_s28, 4  ;;  %s202_s29 = int_to_ptr.vmem [resolvable:$true] %s201_s29 }
   0xd   : > { %p1497_p5 = pnand %p898_p2, %p183_p3  ;;  %s32_s6 = sadd.s32 1, %s1408_s24 }
   0xe   : > { %s1734_s26 = scalar_select %p1493_p4, 1, 0 }
   0xf   : > { %s1735_s27 = scalar_select %p1497_p5, 1, 0 }
  0x10   : > { %p1127_p6 = pneg %p1497_p5  ;;  %s1236_s9 = scalar_lea.hbm %s1728_s4, 1024 }
  0x11   : > { %p1237_p8 = scmp.ne.s32.totalorder %s1728_s4, %s1236_s9  ;;  %p1243_p12 = scmp.lt.u32.totalorder %s1236_s9, %s1728_s4 }
  0x12   : > { %p1505_p7 = pnand %p1127_p6, %p1730_p1 }
  0x14   : > { %p1238_p9 = pneg %p1505_p7 }
  0x16   : > { %p1239_p10 = pnand %p1238_p9, %p1237_p8 }
  0x18   : > { %p1240_p11 = pneg %p1239_p10 }
  0x1a   : > { %p1245_p13 = pnand %p1243_p12, %p1240_p11 }
  0x1c   : > { %1248 = shalt.err (!%p1245_p13)
}
  0x1d   : > { %s1249_s14 = scalar_lea.vmem %s202_s29, 1024  ;;  %p1257_p6 = scmp.lt.s32.totalorder %s202_s29, %s202_s29 }
  0x1e   : > { %p1250_p0 = scmp.ne.s32.totalorder %s202_s29, %s1249_s14  ;;  %p1258_p1 = scmp.lt.s32.totalorder %s1249_s14, %s1249_s14 }
  0x20   : > { %p1252_p2 = pnand %p1250_p0, %p1238_p9  ;;  %p1259_p4 = por %p1258_p1, %p1257_p6 }
  0x22   : > { %p1253_p3 = pneg %p1252_p2 }
  0x24   : > { %p1260_p5 = pnand %p1259_p4, %p1253_p3 }
  0x26   : > { %1263 = shalt.err (!%p1260_p5)
}
  0x27   : > { %s1733_s15 = smov 64   ;;  %s1416_s16 = smov 4  }
  0x28   : > { %1130 = dma.hbm_to_vmem [thread:$0]  (!%p1505_p7), %s1728_s4, 1024, %s202_s29, [#allocation8], %s1733_s15, %s1733_s15, %s1416_s16  }
  0x29   : > { %p33_p1 = scmp.ge.s32.totalorder %s32_s6, 2  ;;  %s65_s19 = sadd.s32 1, %s1400_s22 }
  0x2a   : > { %p72_p4 = scmp.ne.s32.totalorder %s1400_s22, %s1396_s21  ;;  %p73_p5 = scmp.eq.s32.totalorder %s1412_s25, 0 }
  0x2b   : > { %s1749_s6 = smov (%p33_p1, %s32_s6), 0  ;;  %p1139_p9 = scmp.lt.s32.totalorder %s1412_s25, 2 }
  0x2c   : > { %p74_p8 = por %p73_p5, %p72_p4  ;;  %s61_s20 = ssub.s32 %s1408_s24, %s1749_s6 }
  0x2d   : > { %s1539_s28 = sand.u32 1, %s1400_s22   ;;  %p63_p10 = scmp.eq.s32.totalorder %s61_s20, 0 }
  0x2e   : > { %s901_s30 = sshll.u32 %s1539_s28, 4  ;;  %s954_s7 = sshll.u32 %s1408_s24, 8 }
  0x2f   : > { %s1544_s8 = scalar_select %p63_p10, %s1400_s22, %s65_s19  }
  0x30   : > { %s1549_s10 = scalar_lea.hbm %s1725_s1, %s954_s7  ;;  %s219_s11 = scalar_lea.vmem [#allocation4], %s901_s30 }
  0x31   : > { %s229_s12 = sshll.u32 %s219_s11, 4  ;;  %p1551_p7 = pnand %p1139_p9, %p74_p8  ;;  %s1555_s12 = int_to_ptr.vmem [resolvable:$true] %s229_s12 }
  0x32   : > { %s904_s14 = sshll.u32 %s1539_s28, 8  ;;  %s216_s17 = scalar_lea.sflag [#allocation5], %s1539_s28 }
  0x33   : > { %s1264_s18 = scalar_lea.hbm %s1549_s10, 256  ;;  %p1266_p12 = pneg %p1551_p7 }
  0x34   : > { %p1265_p11 = scmp.ne.s32.totalorder %s1549_s10, %s1264_s18  ;;  %s1269_s30 = scalar_lea.hbm %s1725_s1, 512 }
  0x35   : > { %p1270_p2 = scmp.lt.u32.totalorder %s1549_s10, %s1725_s1  ;;  %p1271_p3 = scmp.lt.u32.totalorder %s1269_s30, %s1264_s18 }
  0x36   : > { %p1267_p13 = pnand %p1266_p12, %p1265_p11  ;;  %p1273_p1 = scmp.lt.u32.totalorder %s1264_s18, %s1549_s10 }
  0x37   : > { %p1272_p6 = por %p1271_p3, %p1270_p2 }
  0x38   : > { %p1268_p0 = pneg %p1267_p13 }
  0x39   : > { %p1274_p4 = por %p1273_p1, %p1272_p6 }
  0x3b   : > { %p1275_p5 = pnand %p1274_p4, %p1268_p0 }
  0x3d   : > { %1278 = shalt.err (!%p1275_p5)
}
  0x3e   : > { %s1279_s9 = scalar_lea.vmem %s1555_s12, 256  ;;  %s1417_s11 = smov [#allocation4]  }
  0x3f   : > { %p1280_p8 = scmp.ne.s32.totalorder %s1555_s12, %s1279_s9  ;;  %s1284_s19 = sshll.u32 %s1417_s11, 4  ;;  %s1285_s19 = int_to_ptr.vmem [resolvable:$false] %s1284_s19 }
  0x40   : > { %s1286_s20 = scalar_lea.vmem %s1285_s19, 512  ;;  %p1287_p11 = scmp.lt.s32.totalorder %s1555_s12, %s1285_s19 }
  0x41   : > { %p1282_p9 = pnand %p1280_p8, %p1266_p12  ;;  %p1288_p13 = scmp.lt.s32.totalorder %s1286_s20, %s1279_s9 }
  0x43   : > { %p1283_p10 = pneg %p1282_p9  ;;  %p1289_p2 = por %p1288_p13, %p1287_p11 }
  0x45   : > { %p1290_p3 = pnand %p1289_p2, %p1283_p10 }
  0x47   : > { %1293 = shalt.err (!%p1290_p3)
}
  0x48   : > { %1134 = dma.hbm_to_vmem [thread:$0]  (!%p1551_p7), %s1549_s10, 256, %s1555_s12, %s216_s17  }
  0x49   : > { %s955_s18 = sshll.u32 %s1408_s24, 12  ;;  %s240_s30 = scalar_lea.vmem [#allocation7], %s904_s14 }
  0x4a   : > { %s247_s7 = sshll.u32 %s240_s30, 4  ;;  %s236_s29 = sand.u32 1, %s1412_s25   ;;  %s1587_s7 = int_to_ptr.vmem [resolvable:$true] %s247_s7 }
  0x4b   : > { %s1593_s19 = scalar_lea.hbm %s1726_s2, %s955_s18  ;;  %s1595_s20 = scalar_lea.sflag [#allocation8], %s236_s29 }
  0x4c   : > { %s1294_s15 = scalar_lea.hbm %s1593_s19, 4096  ;;  %s1299_s12 = scalar_lea.hbm %s1726_s2, 8192 }
  0x4d   : > { %p1295_p0 = scmp.ne.s32.totalorder %s1593_s19, %s1294_s15  ;;  %p1300_p4 = scmp.lt.u32.totalorder %s1593_s19, %s1726_s2 }
  0x4e   : > { %p1301_p5 = scmp.lt.u32.totalorder %s1299_s12, %s1294_s15  ;;  %p1303_p9 = scmp.lt.u32.totalorder %s1294_s15, %s1593_s19 }
  0x4f   : > { %p1297_p6 = pnand %p1295_p0, %p1266_p12 }
  0x50   : > { %p1302_p8 = por %p1301_p5, %p1300_p4 }
  0x51   : > { %p1298_p1 = pneg %p1297_p6 }
  0x52   : > { %p1304_p10 = por %p1303_p9, %p1302_p8 }
  0x54   : > { %p1305_p11 = pnand %p1304_p10, %p1298_p1 }
  0x56   : > { %1308 = shalt.err (!%p1305_p11)
}
  0x57   : > { %s1309_s18 = scalar_lea.vmem %s1587_s7, 4096  ;;  %s1418_s30 = smov [#allocation7]  }
  0x58   : > { %p1310_p13 = scmp.ne.s32.totalorder %s1587_s7, %s1309_s18  ;;  %s1314_s29 = sshll.u32 %s1418_s30, 4  ;;  %s1315_s29 = int_to_ptr.vmem [resolvable:$false] %s1314_s29 }
  0x59   : > { %s1316_s9 = scalar_lea.vmem %s1315_s29, 8192  ;;  %p1317_p0 = scmp.lt.s32.totalorder %s1587_s7, %s1315_s29 }
  0x5a   : > { %p1312_p2 = pnand %p1310_p13, %p1266_p12  ;;  %p1318_p6 = scmp.lt.s32.totalorder %s1316_s9, %s1309_s18 }
  0x5c   : > { %p1313_p3 = pneg %p1312_p2  ;;  %p1319_p4 = por %p1318_p6, %p1317_p0 }
  0x5e   : > { %p1320_p5 = pnand %p1319_p4, %p1313_p3 }
  0x60   : > { %1323 = shalt.err (!%p1320_p5)
}
  0x61   : > { %s1738_s15 = smov 64   ;;  %p1739_p12 = scmp.ne.s32.totalorder %s1735_s27, 0 }
  0x62   : > { %1137 = dma.hbm_to_vmem [thread:$0]  (!%p1551_p7), %s1593_s19, 4096, %s1587_s7, %s1595_s20, %s1738_s15, %s1738_s15, %s1416_s16  }
  0x63   : > { %259 = sbr.rel (%p1739_p12) target bundleno = 783 (0x30f), region = 40  ;;  %s261_s11 = sand.u32 (!%p1739_p12), 1, %s1396_s21  }
  0x64   : > { %s908_s28 = sshll.u32 (!%p1739_p12), %s261_s11, 4  ;;  %s262_s10 = scalar_lea.sflag (!%p1739_p12), [#allocation5], %s261_s11 }
  0x65   : > { %s1627_s12 = scalar_lea.vmem (!%p1739_p12), [#allocation4], %s908_s28  ;;  %p1740_p1 = scmp.ne.s32.totalorder (!%p1739_p12), %s1734_s26, 0 }
  0x6a   : > { %1375 = dma.done.wait (%p1740_p1), %s262_s10, 256  }
  0x6b   : > { %1377 = vsyncadd (%p1740_p1), %s262_s10, 4294967040  ;;  %s270_s13 = sand.u32 1, %s1485_s0   ;;  %s909_s14 = sshll.u32 %s261_s11, 8 }
  0x6c   : > { %s271_s16 = scalar_lea.sflag [#allocation8], %s270_s13  ;;  %s1634_s7 = scalar_lea.vmem [#allocation7], %s909_s14 }
  0x6d   : > { %1379 = dma.done.wait (%p1740_p1), %s271_s16, 4096  }
  0x6e   : > { %1381 = vsyncadd (%p1740_p1), %s271_s16, 4294963200  ;;  %p1741_p7 = scmp.eq.s32.totalorder %s1485_s0, 0 }
  0x70   : > { %1383 = dma.done.wait (%p1741_p7), [#allocation8], 1024   ;;  %p1742_p8 = pmov %p1741_p7 }
  0x71   : > { %p911_p9 = scmp.ne.s32.totalorder %s1404_s23, 0 }
  0x72   : > { %1385 = vsyncadd (%p1742_p8), [#allocation8], 4294966272  ;;  %v912_v0 = vld [vmem:[%s1727_s3] ss:$0 sm:$0xff] (!%p911_p9) }
  0x73   : > { %311 = sbr.rel (%p911_p9) target bundleno = 122 (0x7a), region = 56  ;;  %319 = vst [vmem:[#allocation2] sm:$0xff] (!%p911_p9), %v912_v0 }
  0x7a PF: > { %v1198_v1 = vld [vmem:[%s1634_s7 + $0x40] sm:$0xff]   ;;  %v1202_v5 = vld [vmem:[%s1634_s7 + $0x48] sm:$0xff]   ;;  %v1206_v9 = vld [vmem:[%s1634_s7 + $0x50] sm:$0xff]   ;;  %p949_p10 = scmp.ne.s32.totalorder %s1404_s23, 1 }
  0x7b   : > { %v1199_v2 = vld [vmem:[%s1634_s7 + $0xc0] sm:$0xff]   ;;  %995 = vmatprep.subr.bf16.mxu0 %v1198_v1  ;;  %v1203_v6 = vld [vmem:[%s1634_s7 + $0xc8] sm:$0xff]   ;;  %v1207_v10 = vld [vmem:[%s1634_s7 + $0xd0] sm:$0xff]   ;;  %v1419_v55 = vmov (!%p949_p10), 0.0|0.0   ;;  %vm1420_vm0 = vmmov (!%p949_p10), 0   ;;  %v1421_v61 = vmov (!%p949_p10), 0.0  }
  0x7c   : > { %v1200_v3 = vld [vmem:[%s1634_s7] sm:$0xff]   ;;  %1017 = vmatprep.subr.bf16.mxu1 %v1199_v2  ;;  %v1204_v7 = vld [vmem:[%s1634_s7 + $0x8] sm:$0xff]   ;;  %v1208_v11 = vld [vmem:[%s1634_s7 + $0x10] sm:$0xff]   ;;  %s685_s23 = sld [smem:[#allocation3]] (!%p949_p10) }
  0x7d   : > { %v1201_v4 = vld [vmem:[%s1634_s7 + $0x80] sm:$0xff]   ;;  %996 = vmatpush3.bf16.msra.mxu0 %v1200_v3  ;;  %v1205_v8 = vld [vmem:[%s1634_s7 + $0x88] sm:$0xff]   ;;  %v1209_v12 = vld [vmem:[%s1634_s7 + $0x90] sm:$0xff]  }
  0x7e   : > { %1018 = vmatpush3.bf16.msra.mxu1 %v1201_v4  ;;  %997 = vmatprep.subr.bf16.mxu0 %v1202_v5  ;;  %v1210_v13 = vld [vmem:[%s1634_s7 + $0x58] sm:$0xff]   ;;  %v1214_v17 = vld [vmem:[%s1634_s7 + $0x60] sm:$0xff]   ;;  %v1218_v21 = vld [vmem:[%s1634_s7 + $0x68] sm:$0xff]  }
  0x7f   : > { %1019 = vmatprep.subr.bf16.mxu1 %v1203_v6  ;;  %v1211_v14 = vld [vmem:[%s1634_s7 + $0xd8] sm:$0xff]   ;;  %v1215_v18 = vld [vmem:[%s1634_s7 + $0xe0] sm:$0xff]   ;;  %v1219_v22 = vld [vmem:[%s1634_s7 + $0xe8] sm:$0xff]  }
  0x80   : > { %v1212_v15 = vld [vmem:[%s1634_s7 + $0x18] sm:$0xff]   ;;  %v1216_v19 = vld [vmem:[%s1634_s7 + $0x20] sm:$0xff]   ;;  %v1220_v23 = vld [vmem:[%s1634_s7 + $0x28] sm:$0xff]  }
  0x81   : > { %998 = vmatpush3.bf16.msra.mxu0 %v1204_v7  ;;  %v1213_v16 = vld [vmem:[%s1634_s7 + $0x98] sm:$0xff]   ;;  %v1217_v20 = vld [vmem:[%s1634_s7 + $0xa0] sm:$0xff]   ;;  %v1221_v24 = vld [vmem:[%s1634_s7 + $0xa8] sm:$0xff]  }
  0x82   : > { %1020 = vmatpush3.bf16.msra.mxu1 %v1205_v8  ;;  %999 = vmatprep.subr.bf16.mxu0 %v1206_v9  ;;  %v1222_v25 = vld [vmem:[%s1634_s7 + $0x70] sm:$0xff]   ;;  %v1226_v29 = vld [vmem:[%s1634_s7 + $0x78] sm:$0xff]   ;;  %v957_v53 = vld [vmem:[#allocation9] sm:$0xff] (!%p949_p10)   ;;  %v686_v2 = vstv (!%p949_p10), %s685_s23 }
  0x83   : > { %1021 = vmatprep.subr.bf16.mxu1 %v1207_v10  ;;  %v1223_v26 = vld [vmem:[%s1634_s7 + $0xf0] sm:$0xff]   ;;  %v1227_v30 = vld [vmem:[%s1634_s7 + $0xf8] sm:$0xff]   ;;  %v988_v56 = vld [vmem:[#allocation9 + $0x8] sm:$0xff] (!%p949_p10)  }
  0x84   : > { %v1224_v27 = vld [vmem:[%s1634_s7 + $0x30] sm:$0xff]   ;;  %v1228_v31 = vld [vmem:[%s1634_s7 + $0x38] sm:$0xff]   ;;  %v991_v59 = vld [vmem:[#allocation9 + $0x20] sm:$0xff] (!%p949_p10)  }
  0x85   : > { %1000 = vmatpush3.bf16.msra.mxu0 %v1208_v11  ;;  %v1225_v28 = vld [vmem:[%s1634_s7 + $0xb0] sm:$0xff]   ;;  %v1229_v32 = vld [vmem:[%s1634_s7 + $0xb8] sm:$0xff]   ;;  %v992_v60 = vld [vmem:[#allocation9 + $0x28] sm:$0xff] (!%p949_p10)  }
  0x86   : > { %1022 = vmatpush3.bf16.msra.mxu1 %v1209_v12  ;;  %1001 = vmatprep.subr.bf16.mxu0 %v1210_v13  ;;  %v321_v33 = vld [vmem:[%s1627_s12] sm:$0xff]  ;;  %v322_v34 = vld [vmem:[%s1627_s12 + $0x8] sm:$0xff] }
  0x87   : > { %1023 = vmatprep.subr.bf16.mxu1 %v1211_v14  ;;  %v913_v35 = vcombine.low %v321_v33, %v321_v33  ;;  %v914_v36 = vcombine.high %v321_v33, %v321_v33  ;;  %v915_v37 = vcombine.low %v322_v34, %v322_v34  ;;  %v916_v38 = vcombine.high %v322_v34, %v322_v34  ;;  %v320_v47 = vld [vmem:[#allocation2] sm:$0xff]  ;;  %v989_v57 = vld [vmem:[#allocation9 + $0x10] sm:$0xff] (!%p949_p10)  }
  0x88   : > { %v990_v58 = vld [vmem:[#allocation9 + $0x18] sm:$0xff] (!%p949_p10)   ;;  %v993_v62 = vld [vmem:[#allocation9 + $0x30] sm:$0xff] (!%p949_p10)  }
  0x89   : > { %1002 = vmatpush3.bf16.msra.mxu0 %v1212_v15  ;;  %625 = vmatprep.mubr.bf16.mxu0 %v914_v36  ;;  %v994_v63 = vld [vmem:[#allocation9 + $0x38] sm:$0xff] (!%p949_p10)  }
  0x8a   : > { %1024 = vmatpush3.bf16.msra.mxu1 %v1213_v16  ;;  %1003 = vmatprep.subr.bf16.mxu0 %v1214_v17 }
  0x8b   : > { %1025 = vmatprep.subr.bf16.mxu1 %v1215_v18  ;;  %665 = vmatprep.mubr.bf16.mxu1 %v916_v38 }
  0x8d   : > { %1004 = vmatpush3.bf16.msra.mxu0 %v1216_v19 }
  0x8e   : > { %1026 = vmatpush3.bf16.msra.mxu1 %v1217_v20  ;;  %1005 = vmatprep.subr.bf16.mxu0 %v1218_v21 }
  0x8f   : > { %1027 = vmatprep.subr.bf16.mxu1 %v1219_v22 }
  0x91   : > { %1006 = vmatpush3.bf16.msra.mxu0 %v1220_v23 }
  0x92   : > { %1028 = vmatpush3.bf16.msra.mxu1 %v1221_v24  ;;  %1007 = vmatprep.subr.bf16.mxu0 %v1222_v25 }
  0x93   : > { %1029 = vmatprep.subr.bf16.mxu1 %v1223_v26 }
  0x95   : > { %1008 = vmatpush3.bf16.msra.mxu0 %v1224_v27 }
  0x96   : > { %1030 = vmatpush3.bf16.msra.mxu1 %v1225_v28  ;;  %1009 = vmatprep.subr.bf16.mxu0 %v1226_v29 }
  0x97   : > { %1031 = vmatprep.subr.bf16.mxu1 %v1227_v30 }
  0x99   : > { %1010 = vmatpush3.bf16.msra.mxu0 %v1228_v31 }
  0x9a   : > { %1032 = vmatpush3.bf16.msra.mxu1 %v1229_v32  ;;  %1091 = vmatprep.subr.bf16.mxu0 (!%p949_p10), %v1419_v55 }
  0x9c   : > { %626 = vmatmul.mubr.bf16.vlgmr.msra.gmra.mrb[0].mxu0 %v913_v35 }
  0x9d   : > { %666 = vmatmul.mubr.bf16.vlgmr.msra.gmra.mrb[0].mxu1 %v915_v37  ;;  %1093 = vmatpush3.bf16.msra.mxu0 (!%p949_p10), %v957_v53 }
  0x9e   : > { %1094 = vmatprep.subr.bf16.mxu0 (!%p949_p10), %v1419_v55  ;;  %1088 = vmatprep.mubr.msk.f32.mxu0 (!%p949_p10), %vm1420_vm0, %v1421_v61 }
  0xa1   : > { %1096 = vmatpush3.bf16.msra.mxu0 (!%p949_p10), %v988_v56 }
  0xa2   : > { %1097 = vmatprep.subr.bf16.mxu0 (!%p949_p10), %v1419_v55 }
  0xa5   : > { %1099 = vmatpush3.bf16.msra.mxu0 (!%p949_p10), %v989_v57 }
  0xa6   : > { %1100 = vmatprep.subr.bf16.mxu0 (!%p949_p10), %v1419_v55 }
  0xa9   : > { %1102 = vmatpush3.bf16.msra.mxu0 (!%p949_p10), %v990_v58 }
  0xaa   : > { %1103 = vmatprep.subr.bf16.mxu0 (!%p949_p10), %v1419_v55 }
  0xad   : > { %1105 = vmatpush3.bf16.msra.mxu0 (!%p949_p10), %v991_v59 }
  0xae   : > { %1106 = vmatprep.subr.bf16.mxu0 (!%p949_p10), %v1419_v55 }
  0xb1   : > { %1108 = vmatpush3.bf16.msra.mxu0 (!%p949_p10), %v992_v60 }
  0xb2   : > { %1109 = vmatprep.subr.bf16.mxu0 (!%p949_p10), %v1419_v55 }
  0xb5   : > { %1111 = vmatpush3.bf16.msra.mxu0 (!%p949_p10), %v993_v62 }
  0xb6   : > { %1112 = vmatprep.subr.bf16.mxu0 (!%p949_p10), %v1419_v55 }
  0xb9   : > { %1114 = vmatpush3.bf16.msra.mxu0 (!%p949_p10), %v994_v63 }
 0x16f   : > { %v1011_v39 = vpop.f32.mrb[0].mxu0 }
 0x170   : > { %v1033_v40 = vpop.f32.mrb[0].mxu1  ;;  %v1012_v41 = vpop.f32.mrb[1].mxu0 }
 0x171   : > { %v1034_v42 = vpop.f32.mrb[1].mxu1  ;;  %v1013_v43 = vadd.f32 %v1012_v41, %v1011_v39  ;;  %v1014_v45 = vpop.f32.mrb[2].mxu0 }
 0x172   : > { %v1035_v44 = vadd.f32 %v1034_v42, %v1033_v40  ;;  %v1036_v46 = vpop.f32.mrb[2].mxu1  ;;  %v1015_v48 = vpop.f32.mrb[3].mxu0  ;;  %678 = sbr.rel (%p949_p10) target bundleno = 758 (0x2f6), region = 60 }
 0x173   : > { %v1037_v49 = vpop.f32.mrb[3].mxu1 }
 0x174   : > { %v668_v50 = vadd.f32 %v1035_v44, %v1013_v43 }
 0x176   : > { %v673_v51 = vadd.f32 %v668_v50, %v320_v47 }
 0x178   : > { %674 = vst [vmem:[#allocation2] sm:$0xff] %v673_v51 }
 0x17f   : > { %v679_v52 = vld [vmem:[#allocation2] sm:$0xff] }
 0x180   : > { %v680_v54 = vmul.f32 %v679_v52, %v679_v52 }
 0x182   : > { %681 = vadd.xlane.f32.xlu0 %v680_v54 }
 0x20f   : > { %v682_v0 = vpop.xlane.xlu0 %681 }
 0x210   : > { %v683_v1 = vadd.f32 1e-12, %v682_v0 }
 0x212   : > { %1234 = vrsqrt.f32 %v683_v1 }
 0x21c   : > { %v1235_v3 = vpop.eup %1234 }
 0x21d   : > { %v687_v4 = vmul.f32 %v1235_v3, %v686_v2 }
 0x21f   : > { %v688_v5 = vmul.f32 %v687_v4, %v679_v52 }
 0x221   : > { %1089 = vmatmul.mubr.f32.vlgmr.msra.gmra.mrb[0].mxu0 %v688_v5 }
 0x2f4   : > { %v787_v6 = vpop.f32.mrb[0].mxu0 }
 0x2f5   : > { %791 = vst [vmem:[#allocation10] sm:$0xff] %v787_v6  ;;  %v1090_v7 = vpop.f32.mrb[1].mxu0 }
 0x2f6 PF: > { %p1141_p11 = scmp.eq.s32.totalorder %s1485_s0, 1  ;;  %s1422_s26 = smov [#allocation10]  }
 0x2f7   : > { %s801_s20 = sshll.u32 %s1422_s26, 4  ;;  %s802_s20 = int_to_ptr.vmem [resolvable:$true] %s801_s20 }
 0x2f8   : > { %s1324_s17 = scalar_lea.vmem %s802_s20, 128  ;;  %p1331_p0 = scmp.lt.s32.totalorder %s802_s20, %s802_s20 }
 0x2f9   : > { %p1325_p13 = scmp.ne.s32.totalorder %s802_s20, %s1324_s17  ;;  %p1332_p6 = scmp.lt.s32.totalorder %s1324_s17, %s1324_s17 }
 0x2fb   : > { %p1326_p2 = pnand %p1325_p13, %p1141_p11  ;;  %p1333_p4 = por %p1332_p6, %p1331_p0 }
 0x2fd   : > { %p1327_p3 = pneg %p1326_p2 }
 0x2ff   : > { %p1334_p5 = pnand %p1333_p4, %p1327_p3 }
 0x301   : > { %1337 = shalt.err (!%p1334_p5)
}
 0x302   : > { %s1338_s29 = scalar_lea.hbm %s1729_s5, 128 }
 0x303   : > { %p1339_p12 = scmp.ne.s32.totalorder %s1729_s5, %s1338_s29  ;;  %p1344_p8 = scmp.lt.u32.totalorder %s1338_s29, %s1729_s5 }
 0x305   : > { %p1340_p1 = pnand %p1339_p12, %p1141_p11 }
 0x307   : > { %p1341_p7 = pneg %p1340_p1 }
 0x309   : > { %p1346_p9 = pnand %p1344_p8, %p1341_p7 }
 0x30b   : > { %1349 = shalt.err (!%p1346_p9)
}
 0x30c   : > { %1124 = dma.vmem_to_hbm [thread:$0]  (%p1141_p11), %s802_s20, 128, %s1729_s5, [#allocation6]  }
 0x30d   : > { %1387 = dma.done.wait (%p1141_p11), [#allocation6], 128  }
 0x30e   : > { %1389 = vsyncadd (%p1141_p11), [#allocation6], 4294967168 }
 0x30f PF: > { %s23_s25 = sadd.s32 1, %s1412_s25   ;;  %s1743_s20 = smov %s1396_s21 }
 0x310   : > { %p20_p10 = scmp.ge.s32.totalorder %s23_s25, 4   ;;  %s1744_s21 = smov %s1400_s22 }
 0x311   : > { %s1745_s22 = smov %s1544_s8  ;;  %s1746_s23 = smov %s1408_s24 }
 0x312   : > { %s1747_s24 = smov %s1749_s6  ;;  %22 = sbr.rel (!%p20_p10) target bundleno = 9 (0x9), region = 103 }
 0x319   :  { %814 = vsyncpa [#allocation5], 1 }
 0x31a   :  { %816 = vsyncpa [#allocation5 + $0x1], 1 }
 0x31b   :  { %817 = vsyncpa [#allocation8], 1 }
 0x31c   :  { %819 = vsyncpa [#allocation8 + $0x1], 1 }
 0x31d   :  { %820 = vsyncpa [#allocation6], 1 }
 0x31e   :  { %822 = vsyncpa [#allocation6 + $0x1], 1 }

</bundles_post_ra>
